<compile_context>
chip_gen: v7x
topology: tpu7x:2x2x1
jax: 0.10.0
libtpu: 0.0.40
codegen_flags: <defaults>
</compile_context>

<pallas_src>
import jax
import jax.numpy as jnp
from jax.experimental import pallas as pl
from jax.experimental.pallas import tpu as pltpu


_LANE = 128
_SUBLANE = 8
# 8192 rows x 128 lanes x 4 B = 4 MiB per f32 block.  Input + output, each
# double-buffered by the Pallas pipeline, = 16 MiB VMEM -> under the 32 MiB
# scoped limit requested below on v5e / v6e / v7x.
_MAX_ROW_TILE = 8192


def _make_quant_kernel(scale, offset, bins):
    """Elementwise fake-quant kernel with the module buffers baked in as
    compile-time constants (they are fixed registered buffers)."""
    # TODO(synk): if scale/offset/bins ever become traced arrays (e.g. QAT-updated
    # scale), pass them as SMEM scalars / scalar-prefetch instead of constants.
    inv_scale = 1.0 / float(scale)
    zp = float(int(offset))
    lo = 0.0 - zp                 # q_min - zero_point
    hi = float(int(bins)) - zp    # q_max - zero_point

    def kernel(x_ref, o_ref):
        # Upcast inside the kernel; HBM traffic stays in the input dtype.
        x = x_ref[...].astype(jnp.float32)
        # torch uses round(x * inv_scale); jnp.round is round-half-to-even,
        # matching std::nearbyint.  Folding zp into the clamp bounds is
        # bit-identical (bounds are small exact integers).
        q = jnp.clip(jnp.round(x * inv_scale), lo, hi)
        o_ref[...] = q.astype(o_ref.dtype)

    return kernel


def linear_quant_shifted(x, bins, scale, offset, *, donate_x=False):
    """Pallas implementation of LinearQuantShifted.forward.

    x: float array of any shape (e.g. NCHW).  Output has x's shape and dtype.
    bins, scale, offset: python scalars matching the module buffers.
    donate_x: set True only if the caller donates x (aliases output onto input).
    """
    orig_shape = x.shape
    orig_dtype = x.dtype
    total = x.size
    if total == 0:
        return x

    x_flat = jnp.ravel(x)  # reshape only; no dtype-conversion pass

    # Lane-dense (rows, 128) view.  Only a ragged tail (< 128 elements) is
    # padded; everything else streams through with no wrapper copies.
    rows = pl.cdiv(total, _LANE)
    needs_pad = rows * _LANE != total
    if needs_pad:
        x_flat = jnp.pad(x_flat, (0, rows * _LANE - total))
    x2d = x_flat.reshape(rows, _LANE)

    # Row tile: blocks capped at 4 MiB f32, and mid-size inputs split into
    # >= 2 grid steps so dimension_semantics=("parallel",) can shard across
    # v7x's two TensorCores.  Partial last blocks are masked by Pallas, so rows
    # is never padded up to a full tile.
    if rows <= _SUBLANE:
        row_tile = rows  # equals the full dim -> satisfies the (8,128) rule
    elif rows <= 2 * _MAX_ROW_TILE:
        row_tile = min(_MAX_ROW_TILE,
                       pl.cdiv(pl.cdiv(rows, 2), _SUBLANE) * _SUBLANE)
    else:
        row_tile = _MAX_ROW_TILE
    grid = (pl.cdiv(rows, row_tile),)

    itemsize = jnp.dtype(orig_dtype).itemsize
    cost = pl.CostEstimate(flops=3 * total, transcendentals=0,
                           bytes_accessed=2 * total * itemsize)

    out2d = pl.pallas_call(
        _make_quant_kernel(scale, offset, bins),
        out_shape=jax.ShapeDtypeStruct((rows, _LANE), orig_dtype),
        grid_spec=pl.GridSpec(
            grid=grid,
            in_specs=[pl.BlockSpec((row_tile, _LANE), lambda i: (i, 0))],
            out_specs=pl.BlockSpec((row_tile, _LANE), lambda i: (i, 0)),
        ),
        compiler_params=pltpu.CompilerParams(
            dimension_semantics=("parallel",),
            vmem_limit_bytes=32 * 1024 * 1024,
        ),
        cost_estimate=cost,
        input_output_aliases=({0: 0} if donate_x else {}),
    )(x2d)

    if needs_pad:
        return out2d.reshape(-1)[:total].reshape(orig_shape)
    return out2d.reshape(orig_shape)


def linear_quant_shifted_ref(x, bins, scale, offset):
    """Pure-JAX reference for correctness checking."""
    xf = x.astype(jnp.float32)
    q = jnp.round(xf * (1.0 / scale)) + offset
    q = jnp.clip(q, 0.0, float(bins))
    return (q - offset).astype(x.dtype)


if __name__ == "__main__":
    # Module "parameters" (buffers) -- deterministic, set in-script.
    bins = 255      # 8-bit range [0, 255]
    scale = 0.1
    offset = 128    # zero point

    key = jax.random.PRNGKey(0)
    x = jax.random.normal(key, (2, 4, 16, 16), dtype=jnp.float32) * 5.0  # NCHW

    out = jax.block_until_ready(linear_quant_shifted(x, bins, scale, offset))
    ref = linear_quant_shifted_ref(x, bins, scale, offset)
    assert out.shape == x.shape and out.dtype == x.dtype
    assert jnp.allclose(out, ref, atol=1e-5), "mismatch vs reference"

    # Ragged total (not a multiple of 128): exercises the tiny (<128 elem) pad
    # + partial-last-block path.
    x_rag = jax.random.normal(jax.random.PRNGKey(1), (3, 5, 7, 16), jnp.float32) * 3.0
    out_rag = jax.block_until_ready(linear_quant_shifted(x_rag, bins, scale, offset))
    assert jnp.allclose(out_rag, linear_quant_shifted_ref(x_rag, bins, scale, offset),
                        atol=1e-5), "mismatch vs reference (ragged)"

    # Larger pad-free path with multiple grid steps (both v7x TCs active).
    x_big = jax.random.normal(jax.random.PRNGKey(2), (8, 32, 64, 64), jnp.float32) * 3.0
    out_big = jax.block_until_ready(linear_quant_shifted(x_big, bins, scale, offset))
    assert jnp.allclose(out_big, linear_quant_shifted_ref(x_big, bins, scale, offset),
                        atol=1e-5), "mismatch vs reference (large)"

    print("KERNEL_OK")
</pallas_src>

<mosaic_0001>
module attributes {stable_mosaic.version = 11 : i64} {
  func.func @kernel(%arg0: i32, %arg1: memref<8x128xf32, #tpu.memory_space<vmem>>, %arg2: memref<8x128xf32, #tpu.memory_space<vmem>>) attributes {dimension_semantics = [#tpu.dimension_semantics<parallel>], iteration_bounds = array<i64: 2>, scalar_prefetch = 0 : i64, scratch_operands = 0 : i64, tpu.core_type = #tpu.core_type<tc>, window_params = [{transform_indices = @transform_0, window_bounds = array<i64: 8, 128>}, {transform_indices = @transform_1, window_bounds = array<i64: 8, 128>}]} {
    %c0 = arith.constant 0 : index
    %c0_0 = arith.constant 0 : index
    %0 = vector.load %arg1[%c0, %c0_0] : memref<8x128xf32, #tpu.memory_space<vmem>>, vector<8x128xf32>
    %cst = arith.constant 1.000000e+01 : f32
    %1 = vector.broadcast %cst : f32 to vector<8x128xf32>
    %2 = arith.mulf %0, %1 : vector<8x128xf32>
    %3 = math.roundeven %2 : vector<8x128xf32>
    %cst_1 = arith.constant -1.280000e+02 : f32
    %cst_2 = arith.constant 1.270000e+02 : f32
    %4 = vector.broadcast %cst_1 : f32 to vector<8x128xf32>
    %5 = arith.maximumf %4, %3 : vector<8x128xf32>
    %6 = vector.broadcast %cst_2 : f32 to vector<8x128xf32>
    %7 = arith.minimumf %6, %5 : vector<8x128xf32>
    %c0_3 = arith.constant 0 : index
    %c0_4 = arith.constant 0 : index
    %8 = vector.load %arg2[%c0_3, %c0_4] : memref<8x128xf32, #tpu.memory_space<vmem>>, vector<8x128xf32>
    tpu.vector_store %arg2[%c0_3, %c0_4], %7 {strides = array<i32>} : memref<8x128xf32, #tpu.memory_space<vmem>>, vector<8x128xf32>,
    return
  }
  func.func @transform_0(%arg0: i32) -> (i32, i32) {
    %c0_i32 = arith.constant 0 : i32
    %c0_i32_0 = arith.constant 0 : i32
    return %arg0, %c0_i32 : i32, i32
  }
  func.func @transform_1(%arg0: i32) -> (i32, i32) {
    %c0_i32 = arith.constant 0 : i32
    %c0_i32_0 = arith.constant 0 : i32
    return %arg0, %c0_i32 : i32, i32
  }
}

</mosaic_0001>

<bundles_post_ra>
// kernel: tpu_custom_call.1
= control target key start
LH: loop header
LB: loop body
LE: loop exit
PB: predicated region body
PF: predicated region fallthrough
CT: control target
= control target key end

     0   :  { %6 = vsyncpa [#allocation3], 0  ;;  %s552_s0 = inlined_call_operand.hbm [shape: f32[16,128], index: 0, kind: input, shape index: {}]   ;;  %s553_s1 = inlined_call_operand.hbm [shape: f32[16,128], index: 1, kind: output, shape index: {}]  }
   0x1   :  { %8 = vsyncpa [#allocation3 + $0x1], 0 }
   0x2   :  { %9 = vsyncpa [#allocation4], 0 }
   0x3   :  { %11 = vsyncpa [#allocation4 + $0x1], 0  ;;  %s391_s6 = smov 0   ;;  %s393_s7 = smov 0  }
   0x4   :  { %s395_s8 = smov 0   ;;  %s397_s9 = smov 0  }
   0x5 LB: > { %s412_s10 = sadd.s32 4294967295, %s377_s9   ;;  %s222_s11 = sadd.s32 4294967294, %s377_s9   ;;  %s377_s9 = sphi %s397_s9, %s568_s9   ;;  %s373_s8 = sphi %s395_s8, %s567_s8   ;;  %s369_s7 = sphi %s393_s7, %s566_s7   ;;  %s365_s6 = sphi %s391_s6, %s565_s6  }
   0x6   : > { %s416_s12 = sadd.s32 1, %s377_s9   ;;  %s24_s13 = sadd.s32 1, %s373_s8 }
   0x7   : > { %s21_s14 = ssub.s32 %s377_s9, %s416_s12  ;;  %p31_p0 = scmp.ne.s32.totalorder %s373_s8, %s369_s7 }
   0x8   : > { %p22_p1 = scmp.eq.s32.totalorder %s21_s14, 0  ;;  %p32_p2 = scmp.eq.s32.totalorder %s377_s9, 0 }
   0x9   : > { %p37_p3 = scmp.ne.s32.totalorder %s369_s7, %s365_s6  ;;  %p38_p4 = scmp.eq.s32.totalorder %s412_s10, 0 }
   0xa   : > { %s428_s15 = scalar_select %p22_p1, %s373_s8, %s24_s13  }
   0xb   : > { %p430_p5 = por %p32_p2, %p31_p0  ;;  %p434_p6 = por %p38_p4, %p37_p3 }
   0xc   : > { %p61_p7 = scmp.eq.s32.totalorder %s412_s10, 1  ;;  %p67_p8 = scmp.eq.s32.totalorder %s222_s11, 1 }
   0xd   : > { %p247_p10 = scmp.lt.s32.totalorder %s377_s9, 2  ;;  %s87_s20 = sand.u32 1, %s373_s8  }
   0xe   : > { %p441_p11 = por %p61_p7, %p31_p0  ;;  %p445_p12 = por %p67_p8, %p37_p3 }
   0xf   : > { %s226_s21 = sshll.u32 %s377_s9, 7  ;;  %s225_s22 = sshll.u32 %s87_s20, 3 }
  0x10   : > { %s557_s18 = scalar_select %p441_p11, 1, 0 }
  0x11   : > { %s558_s19 = scalar_select %p445_p12, 1, 0 }
  0x12   : > { %s454_s25 = scalar_lea.hbm %s552_s0, %s226_s21  ;;  %s91_s26 = scalar_lea.vmem [#allocation2], %s225_s22 }
  0x13   : > { %s98_s27 = sshll.u32 %s91_s26, 4  ;;  %p458_p13 = pnand %p247_p10, %p430_p5  ;;  %s462_s27 = int_to_ptr.vmem [resolvable:$true] %s98_s27 }
  0x14   : > { %s88_s29 = scalar_lea.sflag [#allocation3], %s87_s20  ;;  %s281_s30 = scalar_lea.hbm %s454_s25, 128 }
  0x15   : > { %p282_p2 = scmp.ne.s32.totalorder %s454_s25, %s281_s30  ;;  %p283_p3 = pneg %p458_p13 }
  0x16   : > { %s286_s4 = scalar_lea.hbm %s552_s0, 256  ;;  %p287_p5 = scmp.lt.u32.totalorder %s454_s25, %s552_s0 }
  0x17   : > { %p284_p4 = pnand %p283_p3, %p282_p2  ;;  %p288_p8 = scmp.lt.u32.totalorder %s286_s4, %s281_s30 }
  0x18   : > { %p290_p9 = scmp.lt.u32.totalorder %s281_s30, %s454_s25 }
  0x19   : > { %p285_p7 = pneg %p284_p4  ;;  %p289_p10 = por %p288_p8, %p287_p5 }
  0x1b   : > { %p291_p0 = por %p290_p9, %p289_p10 }
  0x1d   : > { %p292_p1 = pnand %p291_p0, %p285_p7 }
  0x1f   : > { %295 = shalt.err (!%p292_p1)
}
  0x20   : > { %s296_s13 = scalar_lea.vmem %s462_s27, 128  ;;  %s379_s14 = smov [#allocation2]  }
  0x21   : > { %p297_p2 = scmp.ne.s32.totalorder %s462_s27, %s296_s13  ;;  %s301_s16 = sshll.u32 %s379_s14, 4  ;;  %s302_s16 = int_to_ptr.vmem [resolvable:$false] %s301_s16 }
  0x22   : > { %s303_s20 = scalar_lea.vmem %s302_s16, 256  ;;  %p304_p11 = scmp.lt.s32.totalorder %s462_s27, %s302_s16 }
  0x23   : > { %p299_p4 = pnand %p297_p2, %p283_p3  ;;  %p305_p5 = scmp.lt.s32.totalorder %s303_s20, %s296_s13 }
  0x25   : > { %p300_p12 = pneg %p299_p4  ;;  %p306_p8 = por %p305_p5, %p304_p11 }
  0x27   : > { %p307_p9 = pnand %p306_p8, %p300_p12 }
  0x29   : > { %310 = shalt.err (!%p307_p9)
}
  0x2a   : > { %242 = dma.hbm_to_vmem [thread:$0]  (!%p458_p13), %s454_s25, 128, %s462_s27, %s88_s29  }
  0x2b   : > { %p560_p0 = scmp.lt.s32.totalorder %s377_s9, 3  ;;  %p561_p1 = scmp.ge.s32.totalorder %s377_s9, 1 }
  0x2d   : > { %p104_p3 = pnand %p561_p1, %p560_p0 }
  0x2e   : > { %s496_s21 = sand.u32 (!%p104_p3), 1, %s369_s7  }
  0x2f   : > { %107 = sbr.rel (%p104_p3) target bundleno = 81 (0x51), region = 24  ;;  %s228_s22 = sshll.u32 (!%p104_p3), %s496_s21, 3 }
  0x30   : > { %s110_s23 = scalar_lea.sflag (!%p104_p3), [#allocation3], %s496_s21  ;;  %s113_s24 = scalar_lea.vmem (!%p104_p3), [#allocation2], %s228_s22 }
  0x36   : > { %356 = dma.done.wait (%p434_p6), %s110_s23, 128  }
  0x37   : > { %358 = vsyncadd (%p434_p6), %s110_s23, 4294967168  ;;  %v132_v0 = vld [vmem:[%s113_s24] sm:$0xff]  ;;  %s131_s25 = scalar_lea.vmem [#allocation5], %s228_s22  ;;  %s231_s27 = sshll.u32 %s412_s10, 7 }
  0x38   : > { %v133_v1 = vmul.f32 10.0, %v132_v0  ;;  %s152_s26 = sshll.u32 %s131_s25, 4  ;;  %s510_s17 = scalar_lea.hbm %s553_s1, %s231_s27  ;;  %s505_s26 = int_to_ptr.vmem [resolvable:$true] %s152_s26 }
  0x39   : > { %s139_s30 = scalar_lea.sflag [#allocation4], %s496_s21  ;;  %s311_s2 = scalar_lea.vmem %s505_s26, 128 }
  0x3a   : > { %v234_v2 = vround.rtne.f32 %v133_v1  ;;  %p312_p6 = scmp.ne.s32.totalorder %s505_s26, %s311_s2  ;;  %p562_p11 = scmp.ne.s32.totalorder %s557_s18, 0 }
  0x3b   : > { %s380_s10 = smov [#allocation5]  }
  0x3c   : > { %v135_v3 = vmax.f32 %v234_v2, -128.0  ;;  %p313_p12 = pnand %p312_p6, %p562_p11  ;;  %s315_s3 = sshll.u32 %s380_s10, 4  ;;  %s316_s3 = int_to_ptr.vmem [resolvable:$false] %s315_s3 }
  0x3d   : > { %s317_s4 = scalar_lea.vmem %s316_s3, 256  ;;  %p318_p7 = scmp.lt.s32.totalorder %s505_s26, %s316_s3 }
  0x3e   : > { %v136_v4 = vmin.f32 %v135_v3, 127.0  ;;  %p314_p13 = pneg %p313_p12  ;;  %p319_p10 = scmp.lt.s32.totalorder %s317_s4, %s311_s2 }
  0x40   : > { %137 = vst [vmem:[%s131_s25] sm:$0xff] %v136_v4  ;;  %p320_p2 = por %p319_p10, %p318_p7 }
  0x42   : > { %p321_p4 = pnand %p320_p2, %p314_p13 }
  0x44   : > { %324 = shalt.err (!%p321_p4)
}
  0x45   : > { %s325_s5 = scalar_lea.hbm %s510_s17, 128  ;;  %s329_s14 = scalar_lea.hbm %s553_s1, 256 }
  0x46   : > { %p326_p5 = scmp.ne.s32.totalorder %s510_s17, %s325_s5  ;;  %p330_p0 = scmp.lt.u32.totalorder %s510_s17, %s553_s1 }
  0x47   : > { %p331_p1 = scmp.lt.u32.totalorder %s329_s14, %s325_s5  ;;  %p333_p6 = scmp.lt.u32.totalorder %s325_s5, %s510_s17 }
  0x48   : > { %p327_p8 = pnand %p326_p5, %p562_p11 }
  0x49   : > { %p332_p3 = por %p331_p1, %p330_p0 }
  0x4a   : > { %p328_p9 = pneg %p327_p8 }
  0x4b   : > { %p334_p12 = por %p333_p6, %p332_p3 }
  0x4d   : > { %p335_p13 = pnand %p334_p12, %p328_p9 }
  0x4f   : > { %338 = shalt.err (!%p335_p13)
}
  0x50   : > { %237 = dma.vmem_to_hbm [thread:$0]  (%p562_p11), %s505_s26, 128, %s510_s17, %s139_s30  }
  0x51 PF: > { %s164_s21 = sand.u32 1, %s365_s6   ;;  %p563_p7 = scmp.ne.s32.totalorder %s558_s19, 0 }
  0x52   : > { %p564_p10 = scmp.ge.s32.totalorder %s377_s9, 2  ;;  %s165_s22 = scalar_lea.sflag [#allocation4], %s164_s21 }
  0x54   : > { %p244_p2 = pnand %p564_p10, %p563_p7 }
  0x56   : > { %360 = dma.done.wait (!%p244_p2), %s165_s22, 128  }
  0x57   : > { %362 = vsyncadd (!%p244_p2), %s165_s22, 4294967168  ;;  %p14_p4 = scmp.ge.s32.totalorder %s416_s12, 4   ;;  %s565_s6 = smov %s369_s7 }
  0x58   : > { %s566_s7 = smov %s373_s8  ;;  %s567_s8 = smov %s428_s15 }
  0x59   : > { %s568_s9 = smov %s416_s12  ;;  %16 = sbr.rel (!%p14_p4) target bundleno = 5 (0x5), region = 69 }
  0x60   :  { %170 = vsyncpa [#allocation3], 1 }
  0x61   :  { %172 = vsyncpa [#allocation3 + $0x1], 1 }
  0x62   :  { %173 = vsyncpa [#allocation4], 1 }
  0x63   :  { %175 = vsyncpa [#allocation4 + $0x1], 1 }

</bundles_post_ra>
